<compile_context>
chip_gen: v5e
topology: v5e:2x2
jax: 0.10.0
libtpu: 0.0.40
codegen_flags: <defaults>
</compile_context>

<pallas_src>
import functools

import jax
import jax.numpy as jnp
from jax.experimental import pallas as pl
from jax.experimental.pallas import tpu as pltpu

LANE = 128  # vreg lane width; feature/class dims padded to this for lane-dense stores


def _round_up(x, m):
    return (x + m - 1) // m * m


def _pad_to(x, shape):
    pads = [(0, t - s) for s, t in zip(x.shape, shape)]
    return jnp.pad(x, pads)


# ----------------- kernel 1: per-node feature transform ------------------- #
# For one row tile of X:
#   Z = X @ W_neigh        (bf16 out -> feeds the big aggregation matmul)
#   S = X @ W_self + b     (f32 out  -> added at the aggregation finalize)
def _sage_transform_kernel(x_ref, ws_ref, wn_ref, b_ref, z_ref, s_ref):
    x = x_ref[...]                                            # (TM, Fp) bf16
    z = jnp.dot(x, wn_ref[...], preferred_element_type=jnp.float32)
    s = jnp.dot(x, ws_ref[...], preferred_element_type=jnp.float32) + b_ref[...]
    z_ref[...] = z.astype(z_ref.dtype)                        # bf16
    s_ref[...] = s.astype(s_ref.dtype)                        # f32


def sage_transform(x, w_self, w_neigh, b, *, tm):
    npad, fp = x.shape
    hp = w_neigh.shape[1]
    return pl.pallas_call(
        _sage_transform_kernel,
        out_shape=(
            jax.ShapeDtypeStruct((npad, hp), jnp.bfloat16),   # Z
            jax.ShapeDtypeStruct((npad, hp), jnp.float32),    # S
        ),
        grid=(npad // tm,),
        in_specs=[
            pl.BlockSpec((tm, fp), lambda m: (m, 0)),
            pl.BlockSpec((fp, hp), lambda m: (0, 0)),
            pl.BlockSpec((fp, hp), lambda m: (0, 0)),
            pl.BlockSpec((1, hp), lambda m: (0, 0)),
        ],
        out_specs=(
            pl.BlockSpec((tm, hp), lambda m: (m, 0)),
            pl.BlockSpec((tm, hp), lambda m: (m, 0)),
        ),
        compiler_params=pltpu.CompilerParams(
            dimension_semantics=("parallel",),
            vmem_limit_bytes=48 << 20,
        ),
    )(x, w_self, w_neigh, b)


# ----------------- kernel 2: neighbor mean aggregation -------------------- #
# grid = (row tiles M, contraction tiles K over A_mean columns / Z rows)
#   acc += A_mean[m,k] @ Z[k]        (bf16 MXU, f32 accumulate)
#   at k==last:  out[m] = act(acc + S[m])
def _sage_aggregate_kernel(a_ref, z_ref, s_ref, o_ref, acc_ref, *, apply_relu):
    k = pl.program_id(1)

    @pl.when(k == 0)
    def _():
        acc_ref[...] = jnp.zeros_like(acc_ref)

    acc_ref[...] += jnp.dot(a_ref[...], z_ref[...],
                            preferred_element_type=jnp.float32)

    @pl.when(k == pl.num_programs(1) - 1)
    def _():
        h = acc_ref[...] + s_ref[...]          # self term + bias, f32 on the VPU
        if apply_relu:
            h = jnp.maximum(h, 0.0)
        o_ref[...] = h.astype(o_ref.dtype)


def sage_aggregate(a_mean, z, s, *, apply_relu, out_dtype, tm, tk):
    npad = a_mean.shape[0]
    hp = z.shape[1]
    kernel = functools.partial(_sage_aggregate_kernel, apply_relu=apply_relu)
    return pl.pallas_call(
        kernel,
        out_shape=jax.ShapeDtypeStruct((npad, hp), out_dtype),
        grid=(npad // tm, npad // tk),
        in_specs=[
            pl.BlockSpec((tm, tk), lambda m, k: (m, k)),   # A_mean tile
            pl.BlockSpec((tk, hp), lambda m, k: (k, 0)),   # neighbor features Z
            pl.BlockSpec((tm, hp), lambda m, k: (m, 0)),   # self term S (resident over k)
        ],
        out_specs=pl.BlockSpec((tm, hp), lambda m, k: (m, 0)),
        scratch_shapes=[pltpu.VMEM((tm, hp), jnp.float32)],
        compiler_params=pltpu.CompilerParams(
            dimension_semantics=("parallel", "arbitrary"),
            vmem_limit_bytes=48 << 20,
        ),
    )(a_mean, z, s)


# ------------------------------ SAGE layers -------------------------------- #

def sage_layer(a_mean, x, w_self, w_neigh, b, *, apply_relu, out_dtype, tm, tk):
    z, s = sage_transform(x, w_self, w_neigh, b, tm=tm)
    return sage_aggregate(a_mean, z, s, apply_relu=apply_relu,
                          out_dtype=out_dtype, tm=tm, tk=tk)


def graphsage_forward(a_mean, features, params, *, tm=128, tk=128):
    """2-layer GraphSAGE forward (inference): relu(sage1) -> sage2 logits.

    The (N,H)-sized intermediate h1 is kept in bf16 to halve its HBM traffic;
    A_mean necessarily streams once per layer either way.
    """
    (w1s, w1n, b1), (w2s, w2n, b2) = params
    h1 = sage_layer(a_mean, features, w1s, w1n, b1,
                    apply_relu=True, out_dtype=jnp.bfloat16, tm=tm, tk=tk)
    # nn.Dropout is identity at inference time.
    # TODO(synk): training-mode dropout via pltpu.prng_seed/prng_random_bits mask.
    logits = sage_layer(a_mean, h1, w2s, w2n, b2,
                        apply_relu=False, out_dtype=jnp.float32, tm=tm, tk=tk)
    return logits


# ------------------------- graph / param staging ---------------------------- #

def mean_normalize_adjacency(adj):
    """SAGE 'mean' aggregator: row-normalize A[dst, src] by in-degree.

    Isolated nodes (zero in-degree) get an all-zero row -> neighbor term = 0,
    matching DGL's mean reducer default.
    """
    adj = adj.astype(jnp.float32)
    deg = jnp.clip(adj.sum(axis=1, keepdims=True), 1.0, None)
    return adj / deg


def xavier_uniform(key, fan_in, fan_out):
    limit = (6.0 / (fan_in + fan_out)) ** 0.5
    return jax.random.uniform(key, (fan_in, fan_out),
                              minval=-limit, maxval=limit, dtype=jnp.float32)


def init_sage_params(key, in_feats, hidden_feats, num_classes):
    k1s, k1n, k2s, k2n = jax.random.split(key, 4)
    layer1 = (xavier_uniform(k1s, in_feats, hidden_feats),
              xavier_uniform(k1n, in_feats, hidden_feats),
              jnp.zeros((1, hidden_feats), jnp.float32))
    layer2 = (xavier_uniform(k2s, hidden_feats, num_classes),
              xavier_uniform(k2n, hidden_feats, num_classes),
              jnp.zeros((1, num_classes), jnp.float32))
    return layer1, layer2


def pad_params_for_tpu(params, fpad, hpad, cpad):
    (w1s, w1n, b1), (w2s, w2n, b2) = params
    return (
        (_pad_to(w1s, (fpad, hpad)).astype(jnp.bfloat16),
         _pad_to(w1n, (fpad, hpad)).astype(jnp.bfloat16),
         _pad_to(b1, (1, hpad))),
        (_pad_to(w2s, (hpad, cpad)).astype(jnp.bfloat16),
         _pad_to(w2n, (hpad, cpad)).astype(jnp.bfloat16),
         _pad_to(b2, (1, cpad))),
    )


# ---------------------------------- main ----------------------------------- #

if __name__ == "__main__":
    # Small synthetic problem consistent with the module:
    #   N nodes, in_feats-dim tweet embeddings, hidden_feats=32, a few classes.
    N = 64
    IN_FEATS = 32
    HIDDEN_FEATS = 32
    NUM_CLASSES = 8

    TM = TK = 128
    NPAD = _round_up(max(N, TM), TM)
    FPAD = _round_up(IN_FEATS, LANE)
    HPAD = _round_up(HIDDEN_FEATS, LANE)
    CPAD = _round_up(NUM_CLASSES, LANE)

    root = jax.random.PRNGKey(0)
    k_adj, k_feat, k_params = jax.random.split(root, 3)

    # Random simple undirected graph (no self-loops / multi-edges), like dgl.to_simple.
    upper = (jax.random.uniform(k_adj, (N, N)) < 0.1).astype(jnp.float32)
    upper = jnp.triu(upper, k=1)
    adj = upper + upper.T                                   # A[dst, src]
    a_mean = mean_normalize_adjacency(adj)

    features = jax.random.normal(k_feat, (N, IN_FEATS), dtype=jnp.float32)
    params = init_sage_params(k_params, IN_FEATS, HIDDEN_FEATS, NUM_CLASSES)

    # Zero-pad to lane-dense, tile-aligned shapes; bf16 for all MXU operands.
    a_mean_p = _pad_to(a_mean, (NPAD, NPAD)).astype(jnp.bfloat16)
    x_p = _pad_to(features, (NPAD, FPAD)).astype(jnp.bfloat16)
    params_p = pad_params_for_tpu(params, FPAD, HPAD, CPAD)

    logits_padded = graphsage_forward(a_mean_p, x_p, params_p, tm=TM, tk=TK)
    logits = logits_padded[:N, :NUM_CLASSES]
    jax.block_until_ready(logits)

    assert logits.shape == (N, NUM_CLASSES)
    assert logits.dtype == jnp.float32
    assert bool(jnp.all(jnp.isfinite(logits)))
    print("KERNEL_OK")
</pallas_src>

<mosaic_0001>
module attributes {stable_mosaic.version = 11 : i64} {
  func.func @_sage_transform_kernel(%arg0: i32, %arg1: memref<128x128xbf16, #tpu.memory_space<vmem>>, %arg2: memref<128x128xbf16, #tpu.memory_space<vmem>>, %arg3: memref<128x128xbf16, #tpu.memory_space<vmem>>, %arg4: memref<1x128xf32, #tpu.memory_space<vmem>>, %arg5: memref<128x128xbf16, #tpu.memory_space<vmem>>, %arg6: memref<128x128xf32, #tpu.memory_space<vmem>>) attributes {dimension_semantics = [#tpu.dimension_semantics<parallel>], iteration_bounds = array<i64: 1>, scalar_prefetch = 0 : i64, scratch_operands = 0 : i64, tpu.core_type = #tpu.core_type<tc>, window_params = [{transform_indices = @transform_0, window_bounds = array<i64: 128, 128>}, {pipeline_mode = #tpu.pipeline_mode<synchronous>, transform_indices = @transform_1, window_bounds = array<i64: 128, 128>}, {pipeline_mode = #tpu.pipeline_mode<synchronous>, transform_indices = @transform_2, window_bounds = array<i64: 128, 128>}, {pipeline_mode = #tpu.pipeline_mode<synchronous>, transform_indices = @transform_3, window_bounds = array<i64: 1, 128>}, {transform_indices = @transform_4, window_bounds = array<i64: 128, 128>}, {transform_indices = @transform_5, window_bounds = array<i64: 128, 128>}]} {
    %c0 = arith.constant 0 : index
    %c0_0 = arith.constant 0 : index
    %0 = vector.load %arg1[%c0, %c0_0] : memref<128x128xbf16, #tpu.memory_space<vmem>>, vector<128x128xbf16>
    %c0_1 = arith.constant 0 : index
    %c0_2 = arith.constant 0 : index
    %1 = vector.load %arg3[%c0_1, %c0_2] : memref<128x128xbf16, #tpu.memory_space<vmem>>, vector<128x128xbf16>
    %cst = arith.constant dense<0.000000e+00> : vector<128x128xf32>
    %2 = tpu.matmul %0, %1, %cst {dimension_numbers = #tpu.dot_dimension_numbers<[1], [0], [0], [1], [0, 0, 1, 1], [], []>} : vector<128x128xbf16>, vector<128x128xbf16>, vector<128x128xf32> -> vector<128x128xf32>
    %c0_3 = arith.constant 0 : index
    %c0_4 = arith.constant 0 : index
    %3 = vector.load %arg2[%c0_3, %c0_4] : memref<128x128xbf16, #tpu.memory_space<vmem>>, vector<128x128xbf16>
    %cst_5 = arith.constant dense<0.000000e+00> : vector<128x128xf32>
    %4 = tpu.matmul %0, %3, %cst_5 {dimension_numbers = #tpu.dot_dimension_numbers<[1], [0], [0], [1], [0, 0, 1, 1], [], []>} : vector<128x128xbf16>, vector<128x128xbf16>, vector<128x128xf32> -> vector<128x128xf32>
    %c0_6 = arith.constant 0 : index
    %c0_7 = arith.constant 0 : index
    %5 = vector.load %arg4[%c0_6, %c0_7] : memref<1x128xf32, #tpu.memory_space<vmem>>, vector<1x128xf32>
    %6 = vector.broadcast %5 : vector<1x128xf32> to vector<128x128xf32>
    %7 = arith.addf %4, %6 : vector<128x128xf32>
    %8 = arith.truncf %2 : vector<128x128xf32> to vector<128x128xbf16>
    %c0_8 = arith.constant 0 : index
    %c0_9 = arith.constant 0 : index
    %9 = vector.load %arg5[%c0_8, %c0_9] : memref<128x128xbf16, #tpu.memory_space<vmem>>, vector<128x128xbf16>
    tpu.vector_store %arg5[%c0_8, %c0_9], %8 {strides = array<i32>} : memref<128x128xbf16, #tpu.memory_space<vmem>>, vector<128x128xbf16>,
    %c0_10 = arith.constant 0 : index
    %c0_11 = arith.constant 0 : index
    %10 = vector.load %arg6[%c0_10, %c0_11] : memref<128x128xf32, #tpu.memory_space<vmem>>, vector<128x128xf32>
    tpu.vector_store %arg6[%c0_10, %c0_11], %7 {strides = array<i32>} : memref<128x128xf32, #tpu.memory_space<vmem>>, vector<128x128xf32>,
    return
  }
  func.func @transform_0(%arg0: i32) -> (i32, i32) {
    %c0_i32 = arith.constant 0 : i32
    %c0_i32_0 = arith.constant 0 : i32
    return %arg0, %c0_i32 : i32, i32
  }
  func.func @transform_1(%arg0: i32) -> (i32, i32) {
    %c0_i32 = arith.constant 0 : i32
    %c0_i32_0 = arith.constant 0 : i32
    %c0_i32_1 = arith.constant 0 : i32
    return %c0_i32, %c0_i32_0 : i32, i32
  }
  func.func @transform_2(%arg0: i32) -> (i32, i32) {
    %c0_i32 = arith.constant 0 : i32
    %c0_i32_0 = arith.constant 0 : i32
    %c0_i32_1 = arith.constant 0 : i32
    return %c0_i32, %c0_i32_0 : i32, i32
  }
  func.func @transform_3(%arg0: i32) -> (i32, i32) {
    %c0_i32 = arith.constant 0 : i32
    %c0_i32_0 = arith.constant 0 : i32
    %c0_i32_1 = arith.constant 0 : i32
    return %c0_i32, %c0_i32_0 : i32, i32
  }
  func.func @transform_4(%arg0: i32) -> (i32, i32) {
    %c0_i32 = arith.constant 0 : i32
    %c0_i32_0 = arith.constant 0 : i32
    return %arg0, %c0_i32 : i32, i32
  }
  func.func @transform_5(%arg0: i32) -> (i32, i32) {
    %c0_i32 = arith.constant 0 : i32
    %c0_i32_0 = arith.constant 0 : i32
    return %arg0, %c0_i32 : i32, i32
  }
}

</mosaic_0001>

<bundles_post_ra>
// kernel: tpu_custom_call.1
= control target key start
LH: loop header
LB: loop body
LE: loop exit
PB: predicated region body
PF: predicated region fallthrough
CT: control target
= control target key end

     0   :  { %11 = vsyncpa [#allocation3], 0  ;;  %s856_s0 = inlined_call_operand.hbm [shape: bf16[128,128], index: 0, kind: input, shape index: {}]   ;;  %s857_s1 = inlined_call_operand.hbm [shape: bf16[128,128], index: 1, kind: input, shape index: {}]   ;;  %s858_s2 = inlined_call_operand.hbm [shape: bf16[128,128], index: 2, kind: input, shape index: {}]   ;;  %s859_s3 = inlined_call_operand.vmem [shape: f32[1,128], index: 3, kind: input, shape index: {}]   ;;  %s860_s4 = inlined_call_operand.hbm [shape: bf16[128,128], index: 4, kind: output, shape index: {0}]   ;;  %s861_s5 = inlined_call_operand.hbm [shape: f32[128,128], index: 5, kind: output, shape index: {1}]  }
   0x1   :  { %12 = vsyncpa [#allocation6], 0 }
   0x2   :  { %13 = vsyncpa [#allocation4], 0 }
   0x3   :  { %14 = vsyncpa [#allocation10], 0  ;;  %s32_s20 = sshll.u32 %s857_s1, 4  ;;  %s769_s21 = smov [#allocation5]   ;;  %s33_s20 = int_to_ptr.hbm [resolvable:$true] %s32_s20 }
   0x4   :  { %s34_s22 = sshll.u32 %s769_s21, 4  ;;  %s19_s25 = sshll.u32 %s856_s0, 4  ;;  %s35_s22 = int_to_ptr.vmem [resolvable:$true] %s34_s22  ;;  %s20_s25 = int_to_ptr.hbm [resolvable:$true] %s19_s25 }
   0x5   :  { %s770_s26 = smov 64   ;;  %s771_s27 = smov 4  }
   0x6   :  { %40 = dma.hbm_to_vmem [thread:$0]  %s33_s20, 1024, %s35_s22, [#allocation6], %s770_s26, %s770_s26, %s771_s27  }
   0x7   :  { %s772_s28 = smov [#allocation2]   ;;  %s45_s1 = sshll.u32 %s858_s2, 4  ;;  %s46_s1 = int_to_ptr.hbm [resolvable:$true] %s45_s1 }
   0x8   :  { %s21_s29 = sshll.u32 %s772_s28, 4  ;;  %s773_s0 = smov [#allocation7]   ;;  %s22_s29 = int_to_ptr.vmem [resolvable:$true] %s21_s29 }
   0x9   :  { %27 = dma.hbm_to_vmem [thread:$0]  %s20_s25, 1024, %s22_s29, [#allocation3], %s770_s26, %s770_s26, %s771_s27  }
   0xa   :  { %s47_s7 = sshll.u32 %s773_s0, 4  ;;  %s48_s7 = int_to_ptr.vmem [resolvable:$true] %s47_s7 }
   0xb   :  { %53 = dma.hbm_to_vmem [thread:$0]  %s46_s1, 1024, %s48_s7, [#allocation6], %s770_s26, %s770_s26, %s771_s27  }
   0xc   :  { %761 = dma.done.wait [#allocation3], 1024  }
   0xd   :  { %762 = vsyncadd [#allocation3], 4294966272 }
   0xe   :  { %763 = dma.done.wait [#allocation6], 2048  }
   0xf   :  { %764 = vsyncadd [#allocation6], 4294965248  ;;  %v559_v0 = vld [vmem:[#allocation7 + $0x38] sm:$0xff]  ;;  %v558_v2 = vld [vmem:[#allocation7 + $0x30] sm:$0xff]  ;;  %s416_s12 = sshll.u32 %s860_s4, 4  ;;  %s775_s13 = smov [#allocation9]   ;;  %s417_s12 = int_to_ptr.hbm [resolvable:$true] %s416_s12 }
  0x10   :  { %v567_v1 = vld [vmem:[#allocation5 + $0x38] sm:$0xff]  ;;  %196 = vmatpush.bf16.msra.mxu0 %v559_v0  ;;  %615 = vmatpush.bf16.msra.mxu2 %v559_v0  ;;  %v566_v3 = vld [vmem:[#allocation5 + $0x30] sm:$0xff]  ;;  %v557_v4 = vld [vmem:[#allocation7 + $0x28] sm:$0xff]  ;;  %s427_s14 = sshll.u32 %s775_s13, 4  ;;  %s429_s17 = sshll.u32 %s861_s5, 4  ;;  %s428_s14 = int_to_ptr.vmem [resolvable:$true] %s427_s14  ;;  %s430_s17 = int_to_ptr.hbm [resolvable:$true] %s429_s17 }
  0x11   :  { %313 = vmatpush.bf16.msra.mxu1 %v567_v1  ;;  %623 = vmatpush.bf16.msra.mxu3 %v567_v1  ;;  %v565_v5 = vld [vmem:[#allocation5 + $0x28] sm:$0xff]  ;;  %v556_v6 = vld [vmem:[#allocation7 + $0x20] sm:$0xff]  ;;  %v555_v8 = vld [vmem:[#allocation7 + $0x18] sm:$0xff]  ;;  %s776_s4 = smov 128   ;;  %s777_s18 = smov 8  }
  0x12   :  { %v564_v7 = vld [vmem:[#allocation5 + $0x20] sm:$0xff]  ;;  %v563_v9 = vld [vmem:[#allocation5 + $0x18] sm:$0xff]  ;;  %v554_v10 = vld [vmem:[#allocation7 + $0x10] sm:$0xff] }
  0x13   :  { %v562_v11 = vld [vmem:[#allocation5 + $0x10] sm:$0xff]  ;;  %v553_v12 = vld [vmem:[#allocation7 + $0x8] sm:$0xff]  ;;  %v552_v14 = vld [vmem:[#allocation7] sm:$0xff] }
  0x14   :  { %197 = vmatpush.bf16.msra.mxu0 %v558_v2  ;;  %616 = vmatpush.bf16.msra.mxu2 %v558_v2  ;;  %v561_v13 = vld [vmem:[#allocation5 + $0x8] sm:$0xff]  ;;  %v560_v15 = vld [vmem:[#allocation5] sm:$0xff]  ;;  %v546_v20 = vld [vmem:[#allocation2 + $0x10] sm:$0xff] }
  0x15   :  { %314 = vmatpush.bf16.msra.mxu1 %v566_v3  ;;  %624 = vmatpush.bf16.msra.mxu3 %v566_v3  ;;  %v544_v16 = vld [vmem:[#allocation2] sm:$0xff]  ;;  %v545_v18 = vld [vmem:[#allocation2 + $0x8] sm:$0xff]  ;;  %v550_v21 = vld [vmem:[#allocation2 + $0x30] sm:$0xff] }
  0x16   :  { %v548_v17 = vld [vmem:[#allocation2 + $0x20] sm:$0xff]  ;;  %v549_v19 = vld [vmem:[#allocation2 + $0x28] sm:$0xff]  ;;  %v547_v22 = vld [vmem:[#allocation2 + $0x18] sm:$0xff] }
  0x17   :  { %v551_v23 = vld [vmem:[#allocation2 + $0x38] sm:$0xff]  ;;  %v829_v24 = vld [vmem:[%s859_s3] ss:$0 sm:$0xff]  ;;  %s774_s3 = smov [#allocation8]  }
  0x18   :  { %198 = vmatpush.bf16.msra.mxu0 %v557_v4  ;;  %617 = vmatpush.bf16.msra.mxu2 %v557_v4  ;;  %s414_s9 = sshll.u32 %s774_s3, 4  ;;  %s415_s9 = int_to_ptr.vmem [resolvable:$true] %s414_s9 }
  0x19   :  { %315 = vmatpush.bf16.msra.mxu1 %v565_v5  ;;  %625 = vmatpush.bf16.msra.mxu3 %v565_v5 }
  0x1c   :  { %199 = vmatpush.bf16.msra.mxu0 %v556_v6  ;;  %618 = vmatpush.bf16.msra.mxu2 %v556_v6 }
  0x1d   :  { %316 = vmatpush.bf16.msra.mxu1 %v564_v7  ;;  %626 = vmatpush.bf16.msra.mxu3 %v564_v7 }
  0x20   :  { %200 = vmatpush.bf16.msra.mxu0 %v555_v8  ;;  %619 = vmatpush.bf16.msra.mxu2 %v555_v8 }
  0x21   :  { %317 = vmatpush.bf16.msra.mxu1 %v563_v9  ;;  %627 = vmatpush.bf16.msra.mxu3 %v563_v9 }
  0x24   :  { %201 = vmatpush.bf16.msra.mxu0 %v554_v10  ;;  %620 = vmatpush.bf16.msra.mxu2 %v554_v10 }
  0x25   :  { %318 = vmatpush.bf16.msra.mxu1 %v562_v11  ;;  %628 = vmatpush.bf16.msra.mxu3 %v562_v11 }
  0x28   :  { %202 = vmatpush.bf16.msra.mxu0 %v553_v12  ;;  %621 = vmatpush.bf16.msra.mxu2 %v553_v12 }
  0x29   :  { %319 = vmatpush.bf16.msra.mxu1 %v561_v13  ;;  %629 = vmatpush.bf16.msra.mxu3 %v561_v13 }
  0x2c   :  { %203 = vmatpush.bf16.msra.mxu0 %v552_v14  ;;  %622 = vmatpush.bf16.msra.mxu2 %v552_v14 }
  0x2d   :  { %320 = vmatpush.bf16.msra.mxu1 %v560_v15  ;;  %630 = vmatpush.bf16.msra.mxu3 %v560_v15 }
  0x2f   :  { %204 = vmatmul.bf16.vlgmr.msra.gmra.mxu0 %v544_v16  ;;  %224 = vmatmul.bf16.vlgmr.msra.gmra.mxu2 %v548_v17 }
  0x30   :  { %321 = vmatmul.bf16.vlgmr.msra.gmra.mxu1 %v544_v16  ;;  %341 = vmatmul.bf16.vlgmr.msra.gmra.mxu3 %v548_v17 }
  0x3f   :  { %209 = vmatmul.bf16.gmra.mxu0 %v545_v18  ;;  %229 = vmatmul.bf16.gmra.mxu2 %v549_v19 }
  0x40   :  { %326 = vmatmul.bf16.gmra.mxu1 %v545_v18  ;;  %346 = vmatmul.bf16.gmra.mxu3 %v549_v19 }
  0x4f   :  { %214 = vmatmul.bf16.gmra.mxu0 %v546_v20  ;;  %234 = vmatmul.bf16.gmra.mxu2 %v550_v21 }
  0x50   :  { %331 = vmatmul.bf16.gmra.mxu1 %v546_v20  ;;  %351 = vmatmul.bf16.gmra.mxu3 %v550_v21 }
  0x5f   :  { %219 = vmatmul.bf16.gmra.mxu0 %v547_v22  ;;  %239 = vmatmul.bf16.gmra.mxu2 %v551_v23 }
  0x60   :  { %336 = vmatmul.bf16.gmra.mxu1 %v547_v22  ;;  %356 = vmatmul.bf16.gmra.mxu3 %v551_v23 }
  0xac   :  { %v205_v25 = vpop.f32.mrf.mxu0 }
  0xad   :  { %v322_v26 = vpop.f32.mrf.mxu1 }
  0xae   :  { %v323_v27 = vadd.f32 %v829_v24, %v322_v26 }
  0xb0   :  { %394 = vst [vmem:[#allocation9] sm:$0xff] %v323_v27 }
  0xb2   :  { %v225_v28 = vpop.f32.mrf.mxu2 }
  0xb3   :  { %v342_v29 = vpop.f32.mrf.mxu3 }
  0xb4   :  { %v343_v30 = vadd.f32 %v829_v24, %v342_v29  ;;  %v207_v31 = vpop.f32.mrf.mxu0 }
  0xb5   :  { %v571_v32 = vpack.c.bf16 %v207_v31, %v205_v25  ;;  %v324_v33 = vpop.f32.mrf.mxu1 }
  0xb6   :  { %402 = vst [vmem:[#allocation9 + $0x40] sm:$0xff] %v343_v30  ;;  %v325_v34 = vadd.f32 %v829_v24, %v324_v33 }
  0xb7   :  { %572 = vst [vmem:[#allocation8] sm:$0xff] %v571_v32  }
  0xb8   :  { %395 = vst [vmem:[#allocation9 + $0x8] sm:$0xff] %v325_v34 }
  0xba   :  { %v227_v35 = vpop.f32.mrf.mxu2 }
  0xbb   :  { %v591_v36 = vpack.c.bf16 %v227_v35, %v225_v28  ;;  %v344_v37 = vpop.f32.mrf.mxu3 }
  0xbc   :  { %v345_v38 = vadd.f32 %v829_v24, %v344_v37  ;;  %v210_v39 = vpop.f32.mrf.mxu0 }
  0xbd   :  { %611 = vst [vmem:[#allocation8 + $0x20] sm:$0xff] %v591_v36   ;;  %v327_v40 = vpop.f32.mrf.mxu1 }
  0xbe   :  { %403 = vst [vmem:[#allocation9 + $0x48] sm:$0xff] %v345_v38  ;;  %v328_v41 = vadd.f32 %v829_v24, %v327_v40 }
  0xc0   :  { %396 = vst [vmem:[#allocation9 + $0x10] sm:$0xff] %v328_v41 }
  0xc2   :  { %v230_v42 = vpop.f32.mrf.mxu2 }
  0xc3   :  { %v347_v43 = vpop.f32.mrf.mxu3 }
  0xc4   :  { %v348_v44 = vadd.f32 %v829_v24, %v347_v43  ;;  %v212_v45 = vpop.f32.mrf.mxu0 }
  0xc5   :  { %v576_v46 = vpack.c.bf16 %v212_v45, %v210_v39  ;;  %v329_v47 = vpop.f32.mrf.mxu1 }
  0xc6   :  { %404 = vst [vmem:[#allocation9 + $0x50] sm:$0xff] %v348_v44  ;;  %v330_v48 = vadd.f32 %v829_v24, %v329_v47 }
  0xc7   :  { %608 = vst [vmem:[#allocation8 + $0x8] sm:$0xff] %v576_v46  }
  0xc8   :  { %397 = vst [vmem:[#allocation9 + $0x18] sm:$0xff] %v330_v48 }
  0xca   :  { %v232_v49 = vpop.f32.mrf.mxu2 }
  0xcb   :  { %v596_v50 = vpack.c.bf16 %v232_v49, %v230_v42  ;;  %v349_v51 = vpop.f32.mrf.mxu3 }
  0xcc   :  { %v350_v52 = vadd.f32 %v829_v24, %v349_v51  ;;  %v215_v53 = vpop.f32.mrf.mxu0 }
  0xcd   :  { %612 = vst [vmem:[#allocation8 + $0x28] sm:$0xff] %v596_v50   ;;  %v332_v54 = vpop.f32.mrf.mxu1 }
  0xce   :  { %405 = vst [vmem:[#allocation9 + $0x58] sm:$0xff] %v350_v52  ;;  %v333_v55 = vadd.f32 %v829_v24, %v332_v54 }
  0xd0   :  { %398 = vst [vmem:[#allocation9 + $0x20] sm:$0xff] %v333_v55 }
  0xd2   :  { %v235_v56 = vpop.f32.mrf.mxu2 }
  0xd3   :  { %v352_v57 = vpop.f32.mrf.mxu3 }
  0xd4   :  { %v353_v58 = vadd.f32 %v829_v24, %v352_v57  ;;  %v217_v59 = vpop.f32.mrf.mxu0 }
  0xd5   :  { %v581_v60 = vpack.c.bf16 %v217_v59, %v215_v53  ;;  %v334_v61 = vpop.f32.mrf.mxu1 }
  0xd6   :  { %406 = vst [vmem:[#allocation9 + $0x60] sm:$0xff] %v353_v58  ;;  %v335_v62 = vadd.f32 %v829_v24, %v334_v61 }
  0xd7   :  { %609 = vst [vmem:[#allocation8 + $0x10] sm:$0xff] %v581_v60  }
  0xd8   :  { %399 = vst [vmem:[#allocation9 + $0x28] sm:$0xff] %v335_v62 }
  0xda   :  { %v237_v63 = vpop.f32.mrf.mxu2 }
  0xdb   :  { %v601_v0 = vpack.c.bf16 %v237_v63, %v235_v56  ;;  %v354_v1 = vpop.f32.mrf.mxu3 }
  0xdc   :  { %v355_v2 = vadd.f32 %v829_v24, %v354_v1  ;;  %v220_v3 = vpop.f32.mrf.mxu0 }
  0xdd   :  { %613 = vst [vmem:[#allocation8 + $0x30] sm:$0xff] %v601_v0   ;;  %v337_v4 = vpop.f32.mrf.mxu1 }
  0xde   :  { %407 = vst [vmem:[#allocation9 + $0x68] sm:$0xff] %v355_v2  ;;  %v338_v5 = vadd.f32 %v829_v24, %v337_v4 }
  0xe0   :  { %400 = vst [vmem:[#allocation9 + $0x30] sm:$0xff] %v338_v5 }
  0xe2   :  { %v240_v6 = vpop.f32.mrf.mxu2 }
  0xe3   :  { %v357_v7 = vpop.f32.mrf.mxu3 }
  0xe4   :  { %v358_v8 = vadd.f32 %v829_v24, %v357_v7  ;;  %v222_v9 = vpop.f32.mrf.mxu0 }
  0xe5   :  { %v586_v10 = vpack.c.bf16 %v222_v9, %v220_v3  ;;  %v339_v11 = vpop.f32.mrf.mxu1 }
  0xe6   :  { %408 = vst [vmem:[#allocation9 + $0x70] sm:$0xff] %v358_v8  ;;  %v340_v12 = vadd.f32 %v829_v24, %v339_v11 }
  0xe7   :  { %610 = vst [vmem:[#allocation8 + $0x18] sm:$0xff] %v586_v10  }
  0xe8   :  { %401 = vst [vmem:[#allocation9 + $0x38] sm:$0xff] %v340_v12 }
  0xea   :  { %v242_v13 = vpop.f32.mrf.mxu2 }
  0xeb   :  { %v606_v14 = vpack.c.bf16 %v242_v13, %v240_v6  ;;  %v359_v15 = vpop.f32.mrf.mxu3 }
  0xec   :  { %v360_v16 = vadd.f32 %v829_v24, %v359_v15 }
  0xed   :  { %614 = vst [vmem:[#allocation8 + $0x38] sm:$0xff] %v606_v14  }
  0xee   :  { %409 = vst [vmem:[#allocation9 + $0x78] sm:$0xff] %v360_v16  ;;  %422 = dma.vmem_to_hbm [thread:$0]  %s415_s9, 1024, %s417_s12, [#allocation4], %s770_s26, %s770_s26, %s771_s27  }
  0xef   :  { %435 = dma.vmem_to_hbm [thread:$0]  %s428_s14, 2048, %s430_s17, [#allocation10], %s776_s4, %s776_s4, %s777_s18  }
  0xf0   :  { %765 = dma.done.wait [#allocation4], 1024  }
  0xf1   :  { %766 = vsyncadd [#allocation4], 4294966272 }
  0xf2   :  { %767 = dma.done.wait [#allocation10], 2048  }
  0xf3   :  { %768 = vsyncadd [#allocation10], 4294965248 }
  0xf4   :  { %444 = vsyncpa [#allocation3], 1 }
  0xf5   :  { %445 = vsyncpa [#allocation6], 1 }
  0xf6   :  { %446 = vsyncpa [#allocation4], 1 }
  0xf7   :  { %447 = vsyncpa [#allocation10], 1 }

</bundles_post_ra>
